<compile_context>
chip_gen: v7x
topology: tpu7x:2x2x1
jax: 0.10.0
libtpu: 0.0.40
codegen_flags: <defaults>
</compile_context>

<pallas_src>
import functools

import jax
import jax.numpy as jnp
from jax.experimental import pallas as pl
from jax.experimental.pallas import tpu as pltpu

IN_FEATURES = 28 * 28   # 784
HIDDEN = 110
HIDDEN_PAD = 128        # zero-padded hidden width (lane-dense, exact)
OUT_FEATURES = 10


def netfull_logits_stats_kernel(x_ref, w1_ref, b1_ref, w2_ref, b2_ref,
                                logits_ref, m_ref, l_ref, *, n, tm):
    """One batch tile (tm rows) per grid step; weights are VMEM-resident.

    Writes the (tm, 10) logits tile and maintains an online dim-0 (batch)
    column-max / scaled sum-exp accumulator in the resident (1, 10) outputs.
    Rows >= n (padding of the last partial tile) are masked out of the stats.
    """
    step = pl.program_id(0)

    # f32 -> bf16 cast in-kernel (free on the VPU, hidden under MXU/DMA).
    x = x_ref[...].astype(jnp.bfloat16)                           # (tm, 784)
    h = jnp.tanh(
        jnp.dot(x, w1_ref[...], preferred_element_type=jnp.float32)
        + b1_ref[...]
    )                                                             # (tm, 128) f32
    z = (jnp.dot(h.astype(jnp.bfloat16), w2_ref[...],
                 preferred_element_type=jnp.float32)
         + b2_ref[...])                                           # (tm, 10) f32
    logits_ref[...] = z

    # Online dim-0 softmax statistics; mask rows beyond the real batch.
    row = step * tm + jax.lax.broadcasted_iota(jnp.int32, (tm, 1), 0)
    valid = row < n                                               # (tm, 1)
    z_masked = jnp.where(valid, z, -jnp.inf)
    tile_max = jnp.max(z_masked, axis=0, keepdims=True)           # (1, 10)

    @pl.when(step == 0)
    def _():
        m_ref[...] = jnp.full((1, OUT_FEATURES), -jnp.inf, jnp.float32)
        l_ref[...] = jnp.zeros((1, OUT_FEATURES), jnp.float32)

    m_prev = m_ref[...]
    m_new = jnp.maximum(m_prev, tile_max)
    p = jnp.where(valid, jnp.exp(z - m_new), 0.0)                 # (tm, 10)
    l_ref[...] = (jnp.exp(m_prev - m_new) * l_ref[...]
                  + jnp.sum(p, axis=0, keepdims=True))
    m_ref[...] = m_new


def log_softmax_apply_kernel(z_ref, m_ref, l_ref, o_ref):
    """out = z - m - log(sum exp(z - m)); statistics are over dim=0 (batch)."""
    o_ref[...] = z_ref[...] - m_ref[...] - jnp.log(l_ref[...])


def pad_params(w1, b1, w2, b2):
    """Pad hidden 110 -> 128 once at init time and cast matmul operands to bf16.
    Exact: tanh(0) = 0 and zero W2 rows contribute 0."""
    w1p = (jnp.zeros((IN_FEATURES, HIDDEN_PAD), jnp.float32)
           .at[:, :HIDDEN].set(w1).astype(jnp.bfloat16))
    b1p = jnp.zeros((1, HIDDEN_PAD), jnp.float32).at[:, :HIDDEN].set(b1[None, :])
    w2p = (jnp.zeros((HIDDEN_PAD, OUT_FEATURES), jnp.float32)
           .at[:HIDDEN, :].set(w2).astype(jnp.bfloat16))
    b2p = b2.reshape(1, OUT_FEATURES).astype(jnp.float32)
    return w1p, b1p, w2p, b2p


def netfull_forward(x_nchw, w1p, b1p, w2p, b2p, *, tile_m=None):
    """x_nchw: (N, 1, 28, 28) f32; padded params from pad_params().
    Returns (N, 10) log-probs normalized over dim=0, as in the module."""
    n = x_nchw.shape[0]
    x2d = x_nchw.reshape(n, IN_FEATURES)          # stays f32; cast in-kernel

    if tile_m is None:
        # Large tile amortizes per-step pipeline overhead; the f32 x double
        # buffer at TM=1024 is ~6.4 MiB (inside v5e's 16 MiB scoped default,
        # well inside v6e/v7x budgets).
        tile_m = 1024
    tm = tile_m if n >= tile_m else max(8, ((n + 7) // 8) * 8)
    nt = pl.cdiv(n, tm)

    kernel_a = functools.partial(netfull_logits_stats_kernel, n=n, tm=tm)

    logits, m, l = pl.pallas_call(
        kernel_a,
        out_shape=(
            jax.ShapeDtypeStruct((n, OUT_FEATURES), jnp.float32),
            jax.ShapeDtypeStruct((1, OUT_FEATURES), jnp.float32),   # col max
            jax.ShapeDtypeStruct((1, OUT_FEATURES), jnp.float32),   # sum-exp
        ),
        grid=(nt,),
        in_specs=[
            # x tiled over the batch -> auto double-buffered DMA over MXU.
            pl.BlockSpec((tm, IN_FEATURES), lambda i: (i, 0)),
            # Weights/biases: constant index_map -> fetched once, VMEM-resident.
            pl.BlockSpec((IN_FEATURES, HIDDEN_PAD), lambda i: (0, 0)),
            pl.BlockSpec((1, HIDDEN_PAD), lambda i: (0, 0)),
            pl.BlockSpec((HIDDEN_PAD, OUT_FEATURES), lambda i: (0, 0)),
            pl.BlockSpec((1, OUT_FEATURES), lambda i: (0, 0)),
        ],
        out_specs=(
            pl.BlockSpec((tm, OUT_FEATURES), lambda i: (i, 0)),
            pl.BlockSpec((1, OUT_FEATURES), lambda i: (0, 0)),   # resident acc
            pl.BlockSpec((1, OUT_FEATURES), lambda i: (0, 0)),   # resident acc
        ),
        # Softmax statistics accumulate across batch tiles -> "arbitrary".
        # (Kernel is HBM-bound on x, so losing 2-TC sharding on v7x costs little.)
        compiler_params=pltpu.CompilerParams(
            dimension_semantics=("arbitrary",)),
    )(x2d, w1p, b1p, w2p, b2p)

    # Tiled apply pass (rows independent -> "parallel"); never holds the whole
    # (N, 10) array in VMEM, so it scales to large N on v7x's 64 MiB VMEM.
    out = pl.pallas_call(
        log_softmax_apply_kernel,
        out_shape=jax.ShapeDtypeStruct((n, OUT_FEATURES), jnp.float32),
        grid=(nt,),
        in_specs=[
            pl.BlockSpec((tm, OUT_FEATURES), lambda i: (i, 0)),
            pl.BlockSpec((1, OUT_FEATURES), lambda i: (0, 0)),
            pl.BlockSpec((1, OUT_FEATURES), lambda i: (0, 0)),
        ],
        out_specs=pl.BlockSpec((tm, OUT_FEATURES), lambda i: (i, 0)),
        compiler_params=pltpu.CompilerParams(
            dimension_semantics=("parallel",)),
    )(logits, m, l)
    return out


def init_params(key):
    """Mimics torch.nn.Linear default init: U(-1/sqrt(fan_in), 1/sqrt(fan_in)).
    Weights stored as (in, out) = transpose of torch's (out, in)."""
    k1, k2, k3, k4 = jax.random.split(key, 4)
    bound1 = 1.0 / jnp.sqrt(jnp.float32(IN_FEATURES))
    bound2 = 1.0 / jnp.sqrt(jnp.float32(HIDDEN))
    w1 = jax.random.uniform(k1, (IN_FEATURES, HIDDEN), jnp.float32, -bound1, bound1)
    b1 = jax.random.uniform(k2, (HIDDEN,), jnp.float32, -bound1, bound1)
    w2 = jax.random.uniform(k3, (HIDDEN, OUT_FEATURES), jnp.float32, -bound2, bound2)
    b2 = jax.random.uniform(k4, (OUT_FEATURES,), jnp.float32, -bound2, bound2)
    return w1, b1, w2, b2


def reference_forward(x_nchw, w1, b1, w2, b2, *, bf16):
    """Pure-JAX reference.  bf16=True mirrors the kernel's matmul dtypes."""
    n = x_nchw.shape[0]
    x2d = x_nchw.reshape(n, IN_FEATURES)
    if bf16:
        h = jnp.tanh(
            jnp.dot(x2d.astype(jnp.bfloat16), w1.astype(jnp.bfloat16),
                    preferred_element_type=jnp.float32) + b1[None, :])
        logits = (jnp.dot(h.astype(jnp.bfloat16), w2.astype(jnp.bfloat16),
                          preferred_element_type=jnp.float32) + b2[None, :])
    else:
        logits = jnp.tanh(x2d @ w1 + b1[None, :]) @ w2 + b2[None, :]
    return jax.nn.log_softmax(logits, axis=0)   # dim=0, as in the module


if __name__ == "__main__":
    key = jax.random.PRNGKey(0)
    k_x1, k_x2, k_p = jax.random.split(key, 3)

    w1, b1, w2, b2 = init_params(k_p)
    w1p, b1p, w2p, b2p = pad_params(w1, b1, w2, b2)

    # Test 1: small batch, single tile (KMNIST-style NCHW input).
    x1 = jax.random.normal(k_x1, (8, 1, 28, 28), jnp.float32)
    out1 = netfull_forward(x1, w1p, b1p, w2p, b2p)
    jax.block_until_ready(out1)
    assert out1.shape == (8, OUT_FEATURES)
    assert jnp.allclose(out1, reference_forward(x1, w1, b1, w2, b2, bf16=True),
                        atol=1e-3, rtol=1e-3)
    assert jnp.allclose(out1, reference_forward(x1, w1, b1, w2, b2, bf16=False),
                        atol=5e-2, rtol=5e-2)

    # Test 2: multi-tile grid with a partial last tile (N=20, tile_m=8 -> 3
    # steps) to exercise the masked online dim-0 softmax accumulation.
    x2 = jax.random.normal(k_x2, (20, 1, 28, 28), jnp.float32)
    out2 = netfull_forward(x2, w1p, b1p, w2p, b2p, tile_m=8)
    jax.block_until_ready(out2)
    assert out2.shape == (20, OUT_FEATURES)
    assert jnp.allclose(out2, reference_forward(x2, w1, b1, w2, b2, bf16=True),
                        atol=1e-3, rtol=1e-3)
    assert jnp.allclose(out2, reference_forward(x2, w1, b1, w2, b2, bf16=False),
                        atol=5e-2, rtol=5e-2)

    print("KERNEL_OK")
</pallas_src>

<mosaic_0001>
module attributes {stable_mosaic.version = 11 : i64} {
  func.func @netfull_logits_stats_kernel(%arg0: i32, %arg1: memref<8x784xf32, #tpu.memory_space<vmem>>, %arg2: memref<784x128xbf16, #tpu.memory_space<vmem>>, %arg3: memref<1x128xf32, #tpu.memory_space<vmem>>, %arg4: memref<128x10xbf16, #tpu.memory_space<vmem>>, %arg5: memref<1x10xf32, #tpu.memory_space<vmem>>, %arg6: memref<8x10xf32, #tpu.memory_space<vmem>>, %arg7: memref<1x10xf32, #tpu.memory_space<vmem>>, %arg8: memref<1x10xf32, #tpu.memory_space<vmem>>) attributes {dimension_semantics = [#tpu.dimension_semantics<arbitrary>], iteration_bounds = array<i64: 1>, scalar_prefetch = 0 : i64, scratch_operands = 0 : i64, tpu.core_type = #tpu.core_type<tc>, window_params = [{transform_indices = @transform_0, window_bounds = array<i64: 8, 784>}, {pipeline_mode = #tpu.pipeline_mode<synchronous>, transform_indices = @transform_1, window_bounds = array<i64: 784, 128>}, {pipeline_mode = #tpu.pipeline_mode<synchronous>, transform_indices = @transform_2, window_bounds = array<i64: 1, 128>}, {pipeline_mode = #tpu.pipeline_mode<synchronous>, transform_indices = @transform_3, window_bounds = array<i64: 128, 10>}, {pipeline_mode = #tpu.pipeline_mode<synchronous>, transform_indices = @transform_4, window_bounds = array<i64: 1, 10>}, {transform_indices = @transform_5, window_bounds = array<i64: 8, 10>}, {pipeline_mode = #tpu.pipeline_mode<synchronous>, transform_indices = @transform_6, window_bounds = array<i64: 1, 10>}, {pipeline_mode = #tpu.pipeline_mode<synchronous>, transform_indices = @transform_7, window_bounds = array<i64: 1, 10>}]} {
    %c0 = arith.constant 0 : index
    %c0_0 = arith.constant 0 : index
    %0 = vector.load %arg1[%c0, %c0_0] : memref<8x784xf32, #tpu.memory_space<vmem>>, vector<8x784xf32>
    %1 = arith.truncf %0 : vector<8x784xf32> to vector<8x784xbf16>
    %c0_1 = arith.constant 0 : index
    %c0_2 = arith.constant 0 : index
    %2 = vector.load %arg2[%c0_1, %c0_2] : memref<784x128xbf16, #tpu.memory_space<vmem>>, vector<784x128xbf16>
    %cst = arith.constant dense<0.000000e+00> : vector<8x128xf32>
    %3 = tpu.matmul %1, %2, %cst {dimension_numbers = #tpu.dot_dimension_numbers<[1], [0], [0], [1], [0, 0, 1, 1], [], []>} : vector<8x784xbf16>, vector<784x128xbf16>, vector<8x128xf32> -> vector<8x128xf32>
    %c0_3 = arith.constant 0 : index
    %c0_4 = arith.constant 0 : index
    %4 = vector.load %arg3[%c0_3, %c0_4] : memref<1x128xf32, #tpu.memory_space<vmem>>, vector<1x128xf32>
    %5 = vector.broadcast %4 : vector<1x128xf32> to vector<8x128xf32>
    %6 = arith.addf %3, %5 : vector<8x128xf32>
    %7 = math.tanh %6 : vector<8x128xf32>
    %8 = arith.truncf %7 : vector<8x128xf32> to vector<8x128xbf16>
    %c0_5 = arith.constant 0 : index
    %c0_6 = arith.constant 0 : index
    %9 = vector.load %arg4[%c0_5, %c0_6] : memref<128x10xbf16, #tpu.memory_space<vmem>>, vector<128x10xbf16>
    %cst_7 = arith.constant dense<0.000000e+00> : vector<8x10xf32>
    %10 = tpu.matmul %8, %9, %cst_7 {dimension_numbers = #tpu.dot_dimension_numbers<[1], [0], [0], [1], [0, 0, 1, 1], [], []>} : vector<8x128xbf16>, vector<128x10xbf16>, vector<8x10xf32> -> vector<8x10xf32>
    %c0_8 = arith.constant 0 : index
    %c0_9 = arith.constant 0 : index
    %11 = vector.load %arg5[%c0_8, %c0_9] : memref<1x10xf32, #tpu.memory_space<vmem>>, vector<1x10xf32>
    %12 = vector.broadcast %11 : vector<1x10xf32> to vector<8x10xf32>
    %13 = arith.addf %10, %12 : vector<8x10xf32>
    %c0_10 = arith.constant 0 : index
    %c0_11 = arith.constant 0 : index
    %14 = vector.load %arg6[%c0_10, %c0_11] : memref<8x10xf32, #tpu.memory_space<vmem>>, vector<8x10xf32>
    tpu.vector_store %arg6[%c0_10, %c0_11], %13 {strides = array<i32>} : memref<8x10xf32, #tpu.memory_space<vmem>>, vector<8x10xf32>,
    %c8_i32 = arith.constant 8 : i32
    %15 = arith.muli %arg0, %c8_i32 : i32
    %16 = tpu.iota {dimensions = array<i32: 0>} : vector<8x1xi32>
    %17 = vector.broadcast %15 : i32 to vector<8x1xi32>
    %18 = arith.addi %17, %16 : vector<8x1xi32>
    %c8_i32_12 = arith.constant 8 : i32
    %19 = vector.broadcast %c8_i32_12 : i32 to vector<8x1xi32>
    %20 = arith.cmpi slt, %18, %19 : vector<8x1xi32>
    %cst_13 = arith.constant 0xFF800000 : f32
    %21 = vector.shape_cast %20 : vector<8x1xi1> to vector<8x1xi1>
    %22 = vector.broadcast %21 : vector<8x1xi1> to vector<8x10xi1>
    %23 = vector.broadcast %cst_13 : f32 to vector<8x10xf32>
    %24 = arith.select %22, %13, %23 : vector<8x10xi1>, vector<8x10xf32>
    %cst_14 = arith.constant dense<0xFF800000> : vector<10xf32>
    %25 = vector.multi_reduction <maximumf>, %24, %cst_14 [0] : vector<8x10xf32> to vector<10xf32>
    %26 = vector.shape_cast %25 : vector<10xf32> to vector<1x10xf32>
    %c0_i32 = arith.constant 0 : i32
    %27 = arith.cmpi eq, %arg0, %c0_i32 : i32
    %28 = arith.extui %27 : i1 to i32
    %c0_i32_15 = arith.constant 0 : i32
    %29 = arith.cmpi ne, %28, %c0_i32_15 : i32
    scf.if %29 {
      %cst_26 = arith.constant 0xFF800000 : f32
      %48 = vector.broadcast %cst_26 : f32 to vector<1x10xf32>
      %c0_27 = arith.constant 0 : index
      %c0_28 = arith.constant 0 : index
      %49 = vector.load %arg7[%c0_27, %c0_28] : memref<1x10xf32, #tpu.memory_space<vmem>>, vector<1x10xf32>
      tpu.vector_store %arg7[%c0_27, %c0_28], %48 {strides = array<i32>} : memref<1x10xf32, #tpu.memory_space<vmem>>, vector<1x10xf32>,
      %cst_29 = arith.constant 0.000000e+00 : f32
      %50 = vector.broadcast %cst_29 : f32 to vector<1x10xf32>
      %c0_30 = arith.constant 0 : index
      %c0_31 = arith.constant 0 : index
      %51 = vector.load %arg8[%c0_30, %c0_31] : memref<1x10xf32, #tpu.memory_space<vmem>>, vector<1x10xf32>
      tpu.vector_store %arg8[%c0_30, %c0_31], %50 {strides = array<i32>} : memref<1x10xf32, #tpu.memory_space<vmem>>, vector<1x10xf32>,
    } else {
    }
    %c0_16 = arith.constant 0 : index
    %c0_17 = arith.constant 0 : index
    %30 = vector.load %arg7[%c0_16, %c0_17] : memref<1x10xf32, #tpu.memory_space<vmem>>, vector<1x10xf32>
    %31 = arith.maximumf %30, %26 : vector<1x10xf32>
    %32 = vector.broadcast %31 : vector<1x10xf32> to vector<8x10xf32>
    %33 = arith.subf %13, %32 : vector<8x10xf32>
    %34 = math.exp %33 : vector<8x10xf32>
    %cst_18 = arith.constant 0.000000e+00 : f32
    %35 = vector.shape_cast %20 : vector<8x1xi1> to vector<8x1xi1>
    %36 = vector.broadcast %35 : vector<8x1xi1> to vector<8x10xi1>
    %37 = vector.broadcast %cst_18 : f32 to vector<8x10xf32>
    %38 = arith.select %36, %34, %37 : vector<8x10xi1>, vector<8x10xf32>
    %39 = arith.subf %30, %31 : vector<1x10xf32>
    %40 = math.exp %39 : vector<1x10xf32>
    %c0_19 = arith.constant 0 : index
    %c0_20 = arith.constant 0 : index
    %41 = vector.load %arg8[%c0_19, %c0_20] : memref<1x10xf32, #tpu.memory_space<vmem>>, vector<1x10xf32>
    %42 = arith.mulf %40, %41 : vector<1x10xf32>
    %cst_21 = arith.constant dense<0.000000e+00> : vector<10xf32>
    %43 = vector.multi_reduction <add>, %38, %cst_21 [0] : vector<8x10xf32> to vector<10xf32>
    %44 = vector.shape_cast %43 : vector<10xf32> to vector<1x10xf32>
    %45 = arith.addf %42, %44 : vector<1x10xf32>
    %c0_22 = arith.constant 0 : index
    %c0_23 = arith.constant 0 : index
    %46 = vector.load %arg8[%c0_22, %c0_23] : memref<1x10xf32, #tpu.memory_space<vmem>>, vector<1x10xf32>
    tpu.vector_store %arg8[%c0_22, %c0_23], %45 {strides = array<i32>} : memref<1x10xf32, #tpu.memory_space<vmem>>, vector<1x10xf32>,
    %c0_24 = arith.constant 0 : index
    %c0_25 = arith.constant 0 : index
    %47 = vector.load %arg7[%c0_24, %c0_25] : memref<1x10xf32, #tpu.memory_space<vmem>>, vector<1x10xf32>
    tpu.vector_store %arg7[%c0_24, %c0_25], %31 {strides = array<i32>} : memref<1x10xf32, #tpu.memory_space<vmem>>, vector<1x10xf32>,
    return
  }
  func.func @transform_0(%arg0: i32) -> (i32, i32) {
    %c0_i32 = arith.constant 0 : i32
    %c0_i32_0 = arith.constant 0 : i32
    return %arg0, %c0_i32 : i32, i32
  }
  func.func @transform_1(%arg0: i32) -> (i32, i32) {
    %c0_i32 = arith.constant 0 : i32
    %c0_i32_0 = arith.constant 0 : i32
    %c0_i32_1 = arith.constant 0 : i32
    return %c0_i32, %c0_i32_0 : i32, i32
  }
  func.func @transform_2(%arg0: i32) -> (i32, i32) {
    %c0_i32 = arith.constant 0 : i32
    %c0_i32_0 = arith.constant 0 : i32
    %c0_i32_1 = arith.constant 0 : i32
    return %c0_i32, %c0_i32_0 : i32, i32
  }
  func.func @transform_3(%arg0: i32) -> (i32, i32) {
    %c0_i32 = arith.constant 0 : i32
    %c0_i32_0 = arith.constant 0 : i32
    %c0_i32_1 = arith.constant 0 : i32
    return %c0_i32, %c0_i32_0 : i32, i32
  }
  func.func @transform_4(%arg0: i32) -> (i32, i32) {
    %c0_i32 = arith.constant 0 : i32
    %c0_i32_0 = arith.constant 0 : i32
    %c0_i32_1 = arith.constant 0 : i32
    return %c0_i32, %c0_i32_0 : i32, i32
  }
  func.func @transform_5(%arg0: i32) -> (i32, i32) {
    %c0_i32 = arith.constant 0 : i32
    %c0_i32_0 = arith.constant 0 : i32
    return %arg0, %c0_i32 : i32, i32
  }
  func.func @transform_6(%arg0: i32) -> (i32, i32) {
    %c0_i32 = arith.constant 0 : i32
    %c0_i32_0 = arith.constant 0 : i32
    %c0_i32_1 = arith.constant 0 : i32
    return %c0_i32, %c0_i32_0 : i32, i32
  }
  func.func @transform_7(%arg0: i32) -> (i32, i32) {
    %c0_i32 = arith.constant 0 : i32
    %c0_i32_0 = arith.constant 0 : i32
    %c0_i32_1 = arith.constant 0 : i32
    return %c0_i32, %c0_i32_0 : i32, i32
  }
}

</mosaic_0001>

<bundles_post_ra>
// kernel: tpu_custom_call.1
= control target key start
LH: loop header
LB: loop body
LE: loop exit
PB: predicated region body
PF: predicated region fallthrough
CT: control target
= control target key end

     0   :  { %13 = vsyncpa [#allocation3], 0  ;;  %s1323_s0 = inlined_call_operand.vmem [shape: f32[8,784], index: 0, kind: input, shape index: {}]   ;;  %s1324_s1 = inlined_call_operand.hbm [shape: bf16[784,128], index: 1, kind: input, shape index: {}]   ;;  %s1325_s2 = inlined_call_operand.vmem [shape: f32[1,128], index: 2, kind: input, shape index: {}]   ;;  %s1326_s3 = inlined_call_operand.vmem [shape: bf16[128,10], index: 3, kind: input, shape index: {}]   ;;  %s1327_s4 = inlined_call_operand.vmem [shape: f32[1,10], index: 4, kind: input, shape index: {}]   ;;  %s1328_s5 = inlined_call_operand.hbm [shape: f32[8,10], index: 5, kind: output, shape index: {0}]   ;;  %s1329_s6 = inlined_call_operand.hbm [shape: f32[1,10], index: 6, kind: output, shape index: {1}]   ;;  %s1330_s7 = inlined_call_operand.hbm [shape: f32[1,10], index: 7, kind: output, shape index: {2}]  }
   0x1   :  { %14 = vsyncpa [#allocation4], 0 }
   0x2   :  { %15 = vsyncpa [#allocation7], 0  ;;  %s1154_s24 = smov [#allocation2]   ;;  %s1060_s28 = scalar_lea.hbm %s1324_s1, 6272 }
   0x3   :  { %s23_s25 = sshll.u32 %s1154_s24, 4  ;;  %p1061_p0 = scmp.ne.s32.totalorder %s1324_s1, %s1060_s28  ;;  %s24_s25 = int_to_ptr.vmem [resolvable:$true] %s23_s25 }
   0x4   :  { %p1064_p1 = scmp.lt.u32.totalorder %s1060_s28, %s1324_s1 }
   0x6   :  { %p1066_p2 = pnand %p1064_p1, %p1061_p0 }
   0x8   :  { %1069 = shalt.err (!%p1066_p2)
}
   0x9   :  { %s1070_s10 = scalar_lea.vmem %s24_s25, 6272  ;;  %p1075_p4 = scmp.lt.s32.totalorder %s24_s25, %s24_s25 }
   0xa   :  { %p1071_p3 = scmp.ne.s32.totalorder %s24_s25, %s1070_s10  ;;  %p1076_p5 = scmp.lt.s32.totalorder %s1070_s10, %s1070_s10 }
   0xc   :  { %p1077_p6 = por %p1076_p5, %p1075_p4 }
   0xe   :  { %p1078_p7 = pnand %p1077_p6, %p1071_p3 }
  0x10   :  { %1081 = shalt.err (!%p1078_p7)
}
  0x11   :  { %s1155_s11 = smov 64   ;;  %s1156_s12 = smov 4  }
  0x12   :  { %29 = dma.hbm_to_vmem [thread:$0]  %s1324_s1, 6272, %s24_s25, [#allocation3], %s1155_s11, %s1155_s11, %s1156_s12  }
  0x13   :  { %1148 = dma.done.wait [#allocation3], 6272  }
  0x14   :  { %1149 = vsyncadd [#allocation3], 4294961024  ;;  %v997_v0 = vld [vmem:[#allocation2 + $0x40] sm:$0xff]   ;;  %v1001_v4 = vld [vmem:[#allocation2 + $0x48] sm:$0xff]   ;;  %v1157_v44 = vmov 0.0   ;;  %vm1158_vm0 = vmmov 0  }
  0x15   :  { %v998_v1 = vld [vmem:[#allocation2] sm:$0xff]   ;;  %885 = vmatprep.subr.bf16.mxu0 %v997_v0  ;;  %v1002_v5 = vld [vmem:[#allocation2 + $0x8] sm:$0xff]   ;;  %v1005_v8 = vld [vmem:[#allocation2 + $0x50] sm:$0xff]   ;;  %vm453_vm1 = vcmask 130048   ;;  %vm752_vm2 = vcmask 73728   ;;  %s1160_s21 = smov [#allocation5]  }
  0x16   :  { %v999_v2 = vld [vmem:[#allocation2 + $0xc0] sm:$0xff]   ;;  %886 = vmatpush3.bf16.msra.mxu0 %v998_v1  ;;  %v1003_v6 = vld [vmem:[#allocation2 + $0xc8] sm:$0xff]   ;;  %v1006_v9 = vld [vmem:[#allocation2 + $0x10] sm:$0xff]   ;;  %754 = vst.msk [vmem:[#allocation8] sm:$0x1] %vm752_vm2, %v1157_v44  ;;  %s789_s22 = sshll.u32 %s1160_s21, 4  ;;  %s790_s22 = int_to_ptr.vmem [resolvable:$true] %s789_s22 }
  0x17   :  { %v1000_v3 = vld [vmem:[#allocation2 + $0x80] sm:$0xff]   ;;  %907 = vmatprep.subr.bf16.mxu1 %v999_v2  ;;  %887 = vmatprep.subr.bf16.mxu0 %v1001_v4  ;;  %v1004_v7 = vld [vmem:[#allocation2 + $0x88] sm:$0xff]   ;;  %v1007_v10 = vld [vmem:[#allocation2 + $0xd0] sm:$0xff]   ;;  %vm730_vm3 = vcmask 80896   ;;  %s1082_s23 = scalar_lea.vmem %s790_s22, 128  ;;  %p1087_p9 = scmp.lt.s32.totalorder %s790_s22, %s790_s22 }
  0x18   :  { %908 = vmatpush3.bf16.msra.mxu1 %v1000_v3  ;;  %v1008_v11 = vld [vmem:[#allocation2 + $0x90] sm:$0xff]   ;;  %v1009_v12 = vld [vmem:[#allocation2 + $0x58] sm:$0xff]   ;;  %v1013_v16 = vld [vmem:[#allocation2 + $0x60] sm:$0xff]   ;;  %p1083_p8 = scmp.ne.s32.totalorder %s790_s22, %s1082_s23  ;;  %p1088_p10 = scmp.lt.s32.totalorder %s1082_s23, %s1082_s23 }
  0x19   :  { %909 = vmatprep.subr.bf16.mxu1 %v1003_v6  ;;  %v1010_v13 = vld [vmem:[#allocation2 + $0x18] sm:$0xff]   ;;  %v1014_v17 = vld [vmem:[#allocation2 + $0x20] sm:$0xff]   ;;  %v1017_v20 = vld [vmem:[#allocation2 + $0x68] sm:$0xff]  }
  0x1a   :  { %888 = vmatpush3.bf16.msra.mxu0 %v1002_v5  ;;  %v1011_v14 = vld [vmem:[#allocation2 + $0xd8] sm:$0xff]   ;;  %v1015_v18 = vld [vmem:[#allocation2 + $0xe0] sm:$0xff]   ;;  %v1018_v21 = vld [vmem:[#allocation2 + $0x28] sm:$0xff]   ;;  %p1089_p11 = por %p1088_p10, %p1087_p9 }
  0x1b   :  { %889 = vmatprep.subr.bf16.mxu0 %v1005_v8  ;;  %v1012_v15 = vld [vmem:[#allocation2 + $0x98] sm:$0xff]   ;;  %v1016_v19 = vld [vmem:[#allocation2 + $0xa0] sm:$0xff]   ;;  %v1019_v22 = vld [vmem:[#allocation2 + $0xe8] sm:$0xff]  }
  0x1c   :  { %910 = vmatpush3.bf16.msra.mxu1 %v1004_v7  ;;  %v1020_v23 = vld [vmem:[#allocation2 + $0xa8] sm:$0xff]   ;;  %v1021_v24 = vld [vmem:[#allocation2 + $0x70] sm:$0xff]   ;;  %v1025_v28 = vld [vmem:[#allocation2 + $0x78] sm:$0xff]   ;;  %p1090_p12 = pnand %p1089_p11, %p1083_p8 }
  0x1d   :  { %911 = vmatprep.subr.bf16.mxu1 %v1007_v10  ;;  %v1022_v25 = vld [vmem:[#allocation2 + $0x30] sm:$0xff]   ;;  %v1026_v29 = vld [vmem:[#allocation2 + $0x38] sm:$0xff]   ;;  %v41_v31 = vld [vmem:[%s1323_s0 + $0x8] sm:$0xff] }
  0x1e   :  { %890 = vmatpush3.bf16.msra.mxu0 %v1006_v9  ;;  %v1023_v26 = vld [vmem:[#allocation2 + $0xf0] sm:$0xff]   ;;  %v1027_v30 = vld [vmem:[#allocation2 + $0xf8] sm:$0xff]   ;;  %v48_v32 = vpack.c.bf16 %v41_v31, %v41_v31  ;;  %v40_v34 = vld [vmem:[%s1323_s0] sm:$0xff] }
  0x1f   :  { %891 = vmatprep.subr.bf16.mxu0 %v1009_v12  ;;  %v1024_v27 = vld [vmem:[#allocation2 + $0xb0] sm:$0xff]   ;;  %v1028_v33 = vld [vmem:[#allocation2 + $0xb8] sm:$0xff]   ;;  %v47_v35 = vpack.c.bf16 %v40_v34, %v40_v34  ;;  %v1029_v36 = vld [vmem:[#allocation2 + $0x140] sm:$0xff]   ;;  %v1159_v34 = vmov -inf  }
  0x20   :  { %912 = vmatpush3.bf16.msra.mxu1 %v1008_v11  ;;  %v43_v37 = vld [vmem:[%s1323_s0 + $0x18] sm:$0xff]  ;;  %489 = vmatprep.mubr.bf16.mxu0 %v48_v32  ;;  %v1030_v39 = vld [vmem:[#allocation2 + $0x100] sm:$0xff]   ;;  %v42_v40 = vld [vmem:[%s1323_s0 + $0x10] sm:$0xff]  ;;  %753 = vst.msk [vmem:[#allocation6] sm:$0x1] %vm752_vm2, %v1159_v34 }
  0x21   :  { %913 = vmatprep.subr.bf16.mxu1 %v1011_v14  ;;  %v50_v38 = vpack.c.bf16 %v43_v37, %v43_v37  ;;  %v49_v41 = vpack.c.bf16 %v42_v40, %v42_v40  ;;  %v1031_v42 = vld [vmem:[#allocation2 + $0x148] sm:$0xff]   ;;  %v1033_v45 = vld [vmem:[#allocation2 + $0x150] sm:$0xff]   ;;  %v1035_v47 = vld [vmem:[#allocation2 + $0x158] sm:$0xff]  }
  0x22   :  { %892 = vmatpush3.bf16.msra.mxu0 %v1010_v13  ;;  %v1032_v43 = vld [vmem:[#allocation2 + $0x108] sm:$0xff]   ;;  %v1034_v46 = vld [vmem:[#allocation2 + $0x110] sm:$0xff]   ;;  %v1036_v48 = vld [vmem:[#allocation2 + $0x118] sm:$0xff]  }
  0x23   :  { %893 = vmatprep.subr.bf16.mxu0 %v1013_v16  ;;  %529 = vmatprep.mubr.bf16.mxu1 %v50_v38  ;;  %v1037_v49 = vld [vmem:[#allocation2 + $0x160] sm:$0xff]   ;;  %v1039_v51 = vld [vmem:[#allocation2 + $0x168] sm:$0xff]   ;;  %v1041_v55 = vld [vmem:[#allocation2 + $0x170] sm:$0xff]  }
  0x24   :  { %914 = vmatpush3.bf16.msra.mxu1 %v1012_v15  ;;  %v1038_v50 = vld [vmem:[#allocation2 + $0x120] sm:$0xff]   ;;  %v1040_v52 = vld [vmem:[#allocation2 + $0x128] sm:$0xff]   ;;  %v46_v57 = vld [vmem:[%s1323_s0 + $0x30] sm:$0xff] }
  0x25   :  { %915 = vmatprep.subr.bf16.mxu1 %v1015_v18  ;;  %v1045_v53 = vld [vmem:[#allocation2 + $0x180] sm:$0xff]   ;;  %v45_v54 = vld [vmem:[%s1323_s0 + $0x28] sm:$0xff]  ;;  %v53_v58 = vpack.c.bf16 %v46_v57, %v46_v57  ;;  %v1042_v59 = vld [vmem:[#allocation2 + $0x130] sm:$0xff]  }
  0x26   :  { %894 = vmatpush3.bf16.msra.mxu0 %v1014_v17  ;;  %v52_v56 = vpack.c.bf16 %v45_v54, %v45_v54  ;;  %v1043_v60 = vld [vmem:[#allocation2 + $0x178] sm:$0xff]   ;;  %v44_v62 = vld [vmem:[%s1323_s0 + $0x20] sm:$0xff]  ;;  %v1047_v1 = vld [vmem:[%s1326_s3 + $0x8] sm:$0xff]  }
  0x27   :  { %895 = vmatprep.subr.bf16.mxu0 %v1017_v20  ;;  %v1044_v61 = vld [vmem:[#allocation2 + $0x138] sm:$0xff]   ;;  %v51_v63 = vpack.c.bf16 %v44_v62, %v44_v62  ;;  %v1046_v0 = vld [vmem:[%s1326_s3] sm:$0xff]   ;;  %v1048_v2 = vld [vmem:[%s1326_s3 + $0x10] sm:$0xff]  }
  0x28   :  { %916 = vmatpush3.bf16.msra.mxu1 %v1016_v19  ;;  %v1049_v3 = vld [vmem:[%s1326_s3 + $0x18] sm:$0xff]   ;;  %v1050_v4 = vld [vmem:[%s1326_s3 + $0x20] sm:$0xff]   ;;  %v1051_v5 = vld [vmem:[%s1326_s3 + $0x28] sm:$0xff]  }
  0x29   :  { %917 = vmatprep.subr.bf16.mxu1 %v1019_v22  ;;  %v1052_v6 = vld [vmem:[%s1326_s3 + $0x30] sm:$0xff]   ;;  %v1053_v7 = vld [vmem:[%s1326_s3 + $0x38] sm:$0xff]   ;;  %v825_v9 = vld [vmem:[%s1325_s2] ss:$0 sm:$0xff] }
  0x2a   :  { %896 = vmatpush3.bf16.msra.mxu0 %v1018_v21 }
  0x2b   :  { %897 = vmatprep.subr.bf16.mxu0 %v1021_v24 }
  0x2c   :  { %918 = vmatpush3.bf16.msra.mxu1 %v1020_v23 }
  0x2d   :  { %919 = vmatprep.subr.bf16.mxu1 %v1023_v26 }
  0x2e   :  { %898 = vmatpush3.bf16.msra.mxu0 %v1022_v25 }
  0x2f   :  { %899 = vmatprep.subr.bf16.mxu0 %v1025_v28 }
  0x30   :  { %920 = vmatpush3.bf16.msra.mxu1 %v1024_v27 }
  0x31   :  { %921 = vmatprep.subr.bf16.mxu1 %v1027_v30 }
  0x32   :  { %900 = vmatpush3.bf16.msra.mxu0 %v1026_v29 }
  0x33   :  { %929 = vmatprep.subr.bf16.mxu0 %v1029_v36 }
  0x34   :  { %922 = vmatpush3.bf16.msra.mxu1 %v1028_v33 }
  0x35   :  { %490 = vmatmul.mubr.bf16.vlgmr.msra.gmra.mrb[0].mxu0 %v47_v35  ;;  %962 = vmatprep.subr.bf16.mxu1 %v1157_v44  ;;  %v876_v35 = vld [vmem:[%s1327_s4] ss:$0 sm:$0xff] }
  0x36   :  { %930 = vmatpush3.bf16.msra.mxu0 %v1030_v39  ;;  %569 = vmatprep.mubr.bf16.mxu0 %v52_v56 }
  0x37   :  { %530 = vmatmul.mubr.bf16.vlgmr.msra.gmra.mrb[0].mxu1 %v49_v41  ;;  %931 = vmatprep.subr.bf16.mxu0 %v1031_v42 }
  0x38   :  { %964 = vmatprep.mubr.msk.bf16.mxu1 %vm1158_vm0, %v1157_v44  ;;  %963 = vmatpush3.bf16.msra.mxu1 %v1045_v53 }
  0x39   :  { %968 = vmatprep.subr.bf16.mxu1 %v1157_v44 }
  0x3a   :  { %932 = vmatpush3.bf16.msra.mxu0 %v1032_v43 }
  0x3b   :  { %933 = vmatprep.subr.bf16.mxu0 %v1033_v45 }
  0x3e   :  { %934 = vmatpush3.bf16.msra.mxu0 %v1034_v46 }
  0x3f   :  { %935 = vmatprep.subr.bf16.mxu0 %v1035_v47  ;;  %965 = vmatmul.mubr.msk.bf16.vlgmr.msra.gmra.mrb[4].mxu1 %vm453_vm1, %v53_v58 }
  0x40   :  { %984 = vmatprep.mubr.msk.bf16.mxu1 %vm1158_vm0, %v1157_v44  ;;  %969 = vmatpush3.bf16.msra.mxu1 %v1046_v0 }
  0x41   :  { %970 = vmatprep.subr.bf16.mxu1 %v1157_v44 }
  0x42   :  { %936 = vmatpush3.bf16.msra.mxu0 %v1036_v48 }
  0x43   :  { %937 = vmatprep.subr.bf16.mxu0 %v1037_v49 }
  0x44   :  { %971 = vmatpush3.bf16.msra.mxu1 %v1047_v1 }
  0x45   :  { %972 = vmatprep.subr.bf16.mxu1 %v1157_v44 }
  0x46   :  { %938 = vmatpush3.bf16.msra.mxu0 %v1038_v50 }
  0x47   :  { %939 = vmatprep.subr.bf16.mxu0 %v1039_v51 }
  0x48   :  { %973 = vmatpush3.bf16.msra.mxu1 %v1048_v2 }
  0x49   :  { %974 = vmatprep.subr.bf16.mxu1 %v1157_v44 }
  0x4a   :  { %940 = vmatpush3.bf16.msra.mxu0 %v1040_v52 }
  0x4b   :  { %941 = vmatprep.subr.bf16.mxu0 %v1041_v55 }
  0x4c   :  { %975 = vmatpush3.bf16.msra.mxu1 %v1049_v3 }
  0x4d   :  { %976 = vmatprep.subr.bf16.mxu1 %v1157_v44 }
  0x4e   :  { %942 = vmatpush3.bf16.msra.mxu0 %v1042_v59 }
  0x4f   :  { %943 = vmatprep.subr.bf16.mxu0 %v1043_v60 }
  0x50   :  { %977 = vmatpush3.bf16.msra.mxu1 %v1050_v4 }
  0x51   :  { %978 = vmatprep.subr.bf16.mxu1 %v1157_v44 }
  0x52   :  { %944 = vmatpush3.bf16.msra.mxu0 %v1044_v61 }
  0x54   :  { %979 = vmatpush3.bf16.msra.mxu1 %v1051_v5 }
  0x55   :  { %570 = vmatmul.mubr.bf16.vlgmr.msra.gmra.mrb[4].mxu0 %v51_v63  ;;  %980 = vmatprep.subr.bf16.mxu1 %v1157_v44 }
  0x58   :  { %981 = vmatpush3.bf16.msra.mxu1 %v1052_v6 }
  0x59   :  { %982 = vmatprep.subr.bf16.mxu1 %v1157_v44 }
  0x5c   :  { %983 = vmatpush3.bf16.msra.mxu1 %v1053_v7 }
 0x108   :  { %v901_v8 = vpop.f32.mrb[0].mxu0 }
 0x109   :  { %v902_v10 = vpop.f32.mrb[1].mxu0 }
 0x10a   :  { %v903_v11 = vadd.f32 %v902_v10, %v901_v8  ;;  %v904_v12 = vpop.f32.mrb[2].mxu0  ;;  %v923_v13 = vpop.f32.mrb[0].mxu1 }
 0x10b   :  { %v905_v14 = vpop.f32.mrb[3].mxu0  ;;  %v924_v16 = vpop.f32.mrb[1].mxu1 }
 0x10c   :  { %v492_v15 = vadd.f32 %v903_v11, %v825_v9  ;;  %v925_v17 = vadd.f32 %v924_v16, %v923_v13  ;;  %v926_v18 = vpop.f32.mrb[2].mxu1 }
 0x10d   :  { %v927_v19 = vpop.f32.mrb[3].mxu1 }
 0x10e   :  { %v532_v20 = vadd.f32 %v925_v17, %v492_v15 }
 0x112   :  { %v611_v21 = vpop.f32.mrb[4].mxu1 }
 0x113   :  { %v966_v22 = vpop.f32.mrb[5].mxu1 }
 0x114   :  { %v614_v23 = vpop.f32.mrb[6].mxu1 }
 0x115   :  { %v967_v24 = vpop.f32.mrb[7].mxu1 }
 0x128   :  { %v945_v25 = vpop.f32.mrb[4].mxu0 }
 0x129   :  { %v946_v26 = vpop.f32.mrb[5].mxu0 }
 0x12a   :  { %v947_v27 = vadd.f32 %v946_v26, %v945_v25  ;;  %v948_v28 = vpop.f32.mrb[6].mxu0 }
 0x12b   :  { %v949_v29 = vpop.f32.mrb[7].mxu0 }
 0x12c   :  { %v572_v30 = vadd.f32 %v947_v27, %v532_v20 }
 0x12e   :  { %v612_v31 = vadd.f32 %v611_v21, %v572_v30 }
 0x130   :  { %1054 = vtanh.f32 %v612_v31 }
 0x13a   :  { %v1055_v32 = vpop.eup %1054 }
 0x13b   :  { %v618_v33 = vpack.c.bf16 %v1055_v32, %v1055_v32 }
 0x13d   :  { %985 = vmatmul.mubr.bf16.vlgmr.msra.gmra.mrb[8].mxu1 %v618_v33 }
 0x210   :  { %v724_v36 = vpop.f32.mrb[8].mxu1 }
 0x211   :  { %v725_v37 = vadd.f32 %v876_v35, %v724_v36  ;;  %v986_v38 = vpop.f32.mrb[9].mxu1 }
 0x212   :  { %v727_v39 = vpop.f32.mrb[10].mxu1 }
 0x213   :  { %v741_v40 = vsel %vm730_vm3, %v725_v37, -inf  ;;  %731 = vst.msk [vmem:[#allocation5] sm:$0xff] %vm730_vm3, %v725_v37  ;;  %v987_v41 = vpop.f32.mrb[11].mxu1 }
 0x214   :  { %v742_v42 = vrot.slane %v741_v40, 4 }
 0x215   :  { %1093 = shalt.err (!%p1090_p12)
}
 0x216   :  { %s1094_s25 = scalar_lea.hbm %s1328_s5, 128 }
 0x217   :  { %p1095_p13 = scmp.ne.s32.totalorder %s1328_s5, %s1094_s25  ;;  %p1098_p0 = scmp.lt.u32.totalorder %s1094_s25, %s1328_s5 }
 0x219   :  { %p1100_p1 = pnand %p1098_p0, %p1095_p13 }
 0x21b   :  { %1103 = shalt.err (!%p1100_p1)
}
 0x21c   :  { %792 = dma.vmem_to_hbm [thread:$0]  %s790_s22, 128, %s1328_s5, [#allocation4]   ;;  %v743_v43 = vmax.f32 %v741_v40, %v742_v42  ;;  %v758_v44 = vlaneseq  ;;  %v755_v49 = vld [vmem:[#allocation6] sm:$0x1] }
 0x21d   :  { %s1161_s9 = smov [#allocation6]  }
 0x21e   :  { %v744_v45 = vrot.slane %v743_v43, 2  ;;  %v759_v47 = vshrl.u32 %v758_v44, 7  ;;  %s799_s10 = sshll.u32 %s1161_s9, 4  ;;  %s800_s10 = int_to_ptr.vmem [resolvable:$true] %s799_s10 }
 0x21f   :  { %s1104_s0 = scalar_lea.vmem %s800_s10, 16  ;;  %s1108_s11 = scalar_lea.vmem %s800_s10, 32 }
 0x220   :  { %v745_v46 = vmax.f32 %v743_v43, %v744_v45  ;;  %v760_v51 = vsub.s32 0, %v759_v47  ;;  %p1105_p2 = scmp.ne.s32.totalorder %s800_s10, %s1104_s0  ;;  %p1109_p3 = scmp.lt.s32.totalorder %s800_s10, %s800_s10 }
 0x221   :  { %p1110_p4 = scmp.lt.s32.totalorder %s1108_s11, %s1104_s0 }
 0x222   :  { %v746_v48 = vrot.slane %v745_v46, 1 }
 0x223   :  { %p1111_p5 = por %p1110_p4, %p1109_p3 }
 0x224   :  { %v747_v50 = vmax.f32 %v745_v46, %v746_v48 }
 0x225   :  { %p1112_p6 = pnand %p1111_p5, %p1105_p2 }
 0x226   :  { %v756_v52 = vmax.f32 %v755_v49, %v747_v50 }
 0x228   :  { %v761_v53 = vrot.slane %v756_v52, %v760_v51  ;;  %782 = vst.msk [vmem:[#allocation6] sm:$0x1] %vm752_vm2, %v756_v52 }
 0x229   :  { %1115 = shalt.err (!%p1112_p6)
}
 0x22a   :  { %s1116_s13 = scalar_lea.hbm %s1329_s6, 16 }
 0x22b   :  { %p1117_p7 = scmp.ne.s32.totalorder %s1329_s6, %s1116_s13  ;;  %p1120_p8 = scmp.lt.u32.totalorder %s1116_s13, %s1329_s6 }
 0x22d   :  { %p1122_p9 = pnand %p1120_p8, %p1117_p7 }
 0x22f   :  { %1125 = shalt.err (!%p1122_p9)
}
 0x230   :  { %802 = dma.vmem_to_hbm [thread:$0]  %s800_s10, 16, %s1329_s6, [#allocation7]   ;;  %v763_v54 = vsub.f32 %v725_v37, %v761_v53  ;;  %v767_v56 = vsub.f32 %v755_v49, %v756_v52  ;;  %v770_v1 = vld [vmem:[#allocation8] sm:$0x1] }
 0x231   :  { %s1162_s19 = smov [#allocation8]  }
 0x232   :  { %v764_v55 = vmul.f32 1.442695, %v763_v54  ;;  %v768_v57 = vmul.f32 1.442695, %v767_v56  ;;  %s809_s20 = sshll.u32 %s1162_s19, 4  ;;  %s810_s20 = int_to_ptr.vmem [resolvable:$true] %s809_s20 }
 0x233   :  { %s1126_s6 = scalar_lea.vmem %s810_s20, 16  ;;  %s1130_s2 = scalar_lea.vmem %s810_s20, 32 }
 0x234   :  { %1056 = vpow2.f32 %v764_v55  ;;  %p1127_p10 = scmp.ne.s32.totalorder %s810_s20, %s1126_s6  ;;  %p1131_p11 = scmp.lt.s32.totalorder %s810_s20, %s810_s20 }
 0x235   :  { %1058 = vpow2.f32 %v768_v57  ;;  %p1132_p12 = scmp.lt.s32.totalorder %s1130_s2, %s1126_s6 }
 0x237   :  { %p1133_p13 = por %p1132_p12, %p1131_p11 }
 0x239   :  { %p1134_p0 = pnand %p1133_p13, %p1127_p10 }
 0x23e   :  { %v1057_v58 = vpop.eup %1056 }
 0x23f   :  { %v772_v59 = vsel %vm730_vm3, %v1057_v58, 0.0  ;;  %v1059_v0 = vpop.eup %1058 }
 0x240   :  { %v773_v60 = vrot.slane %v772_v59, 4  ;;  %v771_v4 = vmul.f32 %v1059_v0, %v770_v1 }
 0x242   :  { %v774_v61 = vadd.f32 %v773_v60, %v772_v59 }
 0x244   :  { %v775_v62 = vrot.slane %v774_v61, 2 }
 0x246   :  { %v776_v63 = vadd.f32 %v775_v62, %v774_v61 }
 0x248   :  { %v777_v2 = vrot.slane %v776_v63, 1 }
 0x24a   :  { %v778_v3 = vadd.f32 %v777_v2, %v776_v63 }
 0x24c   :  { %v779_v5 = vadd.f32 %v778_v3, %v771_v4 }
 0x24e   :  { %781 = vst.msk [vmem:[#allocation8] sm:$0x1] %vm752_vm2, %v779_v5 }
 0x24f   :  { %1137 = shalt.err (!%p1134_p0)
}
 0x250   :  { %s1138_s22 = scalar_lea.hbm %s1330_s7, 16 }
 0x251   :  { %p1139_p1 = scmp.ne.s32.totalorder %s1330_s7, %s1138_s22  ;;  %p1142_p2 = scmp.lt.u32.totalorder %s1138_s22, %s1330_s7 }
 0x253   :  { %p1144_p3 = pnand %p1142_p2, %p1139_p1 }
 0x255   :  { %1147 = shalt.err (!%p1144_p3)
}
 0x256   :  { %812 = dma.vmem_to_hbm [thread:$0]  %s810_s20, 16, %s1330_s7, [#allocation7]  }
 0x257   :  { %1150 = dma.done.wait [#allocation4], 128  }
 0x258   :  { %1151 = vsyncadd [#allocation4], 4294967168 }
 0x259   :  { %1152 = dma.done.wait [#allocation7], 32  }
 0x25a   :  { %1153 = vsyncadd [#allocation7], 4294967264 }
 0x25b   :  { %822 = vsyncpa [#allocation3], 1 }
 0x25c   :  { %823 = vsyncpa [#allocation4], 1 }
 0x25d   :  { %824 = vsyncpa [#allocation7], 1 }

</bundles_post_ra>
